<compile_context>
chip_gen: v7x
topology: tpu7x:2x2x1
jax: 0.10.0
libtpu: 0.0.40
codegen_flags: <defaults>
</compile_context>

<pallas_src>
import functools

import jax
import jax.numpy as jnp
from jax.experimental import pallas as pl
from jax.experimental.pallas import tpu as pltpu

LANE = 128     # lane width (last dim)
SUBLANE = 8    # sublane width (second-to-last dim)


def _round_up(n, m):
    return ((n + m - 1) // m) * m


def _pad2d(a, rows, cols):
    return jnp.pad(a, ((0, rows - a.shape[0]), (0, cols - a.shape[1])))


def dqn_kernel(x_ref, w1_ref, b1_ref, w2_ref, b2_ref, w3_ref, b3_ref, o_ref):
    # Three MXU matmuls (bf16 operands, f32 accumulation) + f32 bias-add / ReLU.
    x = x_ref[...]                                       # (TB, IN_P) bf16

    h1 = jnp.dot(x, w1_ref[...], preferred_element_type=jnp.float32) + b1_ref[...]
    h1 = jnp.maximum(h1, 0.0)

    h2 = jnp.dot(h1.astype(w2_ref.dtype), w2_ref[...],
                 preferred_element_type=jnp.float32) + b2_ref[...]
    h2 = jnp.maximum(h2, 0.0)

    out = jnp.dot(h2.astype(w3_ref.dtype), w3_ref[...],
                  preferred_element_type=jnp.float32) + b3_ref[...]
    o_ref[...] = out.astype(o_ref.dtype)                 # lane-dense (TB, OUT_P) store


@functools.partial(jax.jit, static_argnames=("block_b",))
def dqn_forward(x, params, block_b=512):
    """x: (B, input_size) f32; params: w1,b1,w2,b2,w3,b3 with weights in (in, out) layout."""
    w1, b1 = params["w1"], params["b1"]
    w2, b2 = params["w2"], params["b2"]
    w3, b3 = params["w3"], params["b3"]

    B, in_size = x.shape
    hid = w1.shape[1]
    out_size = w3.shape[1]

    # Pad feature dims to lane multiples (exact: padded columns are zero).
    in_p = _round_up(in_size, LANE)
    hid_p = _round_up(hid, LANE)
    out_p = _round_up(out_size, LANE)

    # Batch tile: multiple of 8 sublanes, capped by block_b.
    tb = min(block_b, _round_up(B, SUBLANE))
    bp = _round_up(B, tb)
    grid_b = bp // tb

    # bf16 matmul operands; f32 biases (bias-add / ReLU stay f32 in the kernel).
    x_p = _pad2d(x, bp, in_p).astype(jnp.bfloat16)
    w1_p = _pad2d(w1, in_p, hid_p).astype(jnp.bfloat16)
    w2_p = _pad2d(w2, hid_p, hid_p).astype(jnp.bfloat16)
    w3_p = _pad2d(w3, hid_p, out_p).astype(jnp.bfloat16)
    b1_p = _pad2d(b1, 1, hid_p)
    b2_p = _pad2d(b2, 1, hid_p)
    b3_p = _pad2d(b3, 1, out_p)

    # Explicit VMEM budget (sized against v7x's 64 MiB physical VMEM; also fine on v5e/v6e).
    vmem_est = (
        2 * tb * in_p * 2                                   # double-buffered x tiles (bf16)
        + 2 * tb * out_p * 4                                # double-buffered out tiles (f32)
        + 2 * (in_p * hid_p + hid_p * hid_p + hid_p * out_p) * 2   # resident weights (bf16)
        + 2 * (2 * hid_p + out_p) * 4                       # biases (f32)
        + 3 * tb * hid_p * 4                                # h1/h2 intermediates + slack (f32)
    )
    vmem_limit = int(min(max(2 * vmem_est, 16 * 1024 * 1024), 48 * 1024 * 1024))

    out_padded = pl.pallas_call(
        dqn_kernel,
        out_shape=jax.ShapeDtypeStruct((bp, out_p), jnp.float32),
        grid=(grid_b,),
        in_specs=[
            pl.BlockSpec((tb, in_p), lambda i: (i, 0)),      # streamed batch tile
            pl.BlockSpec((in_p, hid_p), lambda i: (0, 0)),   # weights: VMEM-resident
            pl.BlockSpec((1, hid_p), lambda i: (0, 0)),
            pl.BlockSpec((hid_p, hid_p), lambda i: (0, 0)),
            pl.BlockSpec((1, hid_p), lambda i: (0, 0)),
            pl.BlockSpec((hid_p, out_p), lambda i: (0, 0)),
            pl.BlockSpec((1, out_p), lambda i: (0, 0)),
        ],
        out_specs=pl.BlockSpec((tb, out_p), lambda i: (i, 0)),
        compiler_params=pltpu.CompilerParams(
            dimension_semantics=("parallel",),
            vmem_limit_bytes=vmem_limit,
        ),
    )(x_p, w1_p, b1_p, w2_p, b2_p, w3_p, b3_p)

    return out_padded[:B, :out_size]


def init_params(key, input_size, output_size, hidden_size):
    """Deterministic init mimicking nn.Linear's uniform(-1/sqrt(fan_in), 1/sqrt(fan_in)).
    Weights are produced directly in (in_features, out_features) layout."""
    keys = jax.random.split(key, 6)

    def linear(kw, kb, fan_in, fan_out):
        bound = 1.0 / jnp.sqrt(jnp.float32(fan_in))
        w = jax.random.uniform(kw, (fan_in, fan_out), jnp.float32, -bound, bound)
        b = jax.random.uniform(kb, (1, fan_out), jnp.float32, -bound, bound)
        return w, b

    w1, b1 = linear(keys[0], keys[1], input_size, hidden_size)
    w2, b2 = linear(keys[2], keys[3], hidden_size, hidden_size)
    w3, b3 = linear(keys[4], keys[5], hidden_size, output_size)
    return {"w1": w1, "b1": b1, "w2": w2, "b2": b2, "w3": w3, "b3": b3}


def dqn_reference(x, p):
    """Pure-JAX reference with the same bf16-operand / f32-accumulate numerics as the kernel."""
    def lin(h, w, b):
        return jnp.dot(h.astype(jnp.bfloat16), w.astype(jnp.bfloat16),
                       preferred_element_type=jnp.float32) + b
    h1 = jnp.maximum(lin(x, p["w1"], p["b1"]), 0.0)
    h2 = jnp.maximum(lin(h1, p["w2"], p["b2"]), 0.0)
    return lin(h2, p["w3"], p["b3"])


if __name__ == "__main__":
    # Small shapes consistent with DQN(input_size, output_size, hidden_size).
    # batch=24 with block_b=8 exercises the batch grid (3 pipelined steps).
    batch, input_size, hidden_size, output_size = 24, 16, 32, 4

    key = jax.random.PRNGKey(0)
    k_x, k_p = jax.random.split(key)
    x = jax.random.normal(k_x, (batch, input_size), jnp.float32)
    params = init_params(k_p, input_size, output_size, hidden_size)

    out = dqn_forward(x, params, block_b=8)
    out = jax.block_until_ready(out)

    ref = dqn_reference(x, params)
    assert out.shape == (batch, output_size)
    assert jnp.allclose(out, ref, atol=2e-3, rtol=2e-3), "Pallas output mismatch vs JAX reference"

    print("KERNEL_OK")
</pallas_src>

<mosaic_0001>
module attributes {stable_mosaic.version = 11 : i64} {
  func.func @dqn_kernel(%arg0: i32, %arg1: memref<8x128xbf16, #tpu.memory_space<vmem>>, %arg2: memref<128x128xbf16, #tpu.memory_space<vmem>>, %arg3: memref<1x128xf32, #tpu.memory_space<vmem>>, %arg4: memref<128x128xbf16, #tpu.memory_space<vmem>>, %arg5: memref<1x128xf32, #tpu.memory_space<vmem>>, %arg6: memref<128x128xbf16, #tpu.memory_space<vmem>>, %arg7: memref<1x128xf32, #tpu.memory_space<vmem>>, %arg8: memref<8x128xf32, #tpu.memory_space<vmem>>) attributes {dimension_semantics = [#tpu.dimension_semantics<parallel>], iteration_bounds = array<i64: 3>, scalar_prefetch = 0 : i64, scratch_operands = 0 : i64, tpu.core_type = #tpu.core_type<tc>, window_params = [{transform_indices = @transform_0, window_bounds = array<i64: 8, 128>}, {pipeline_mode = #tpu.pipeline_mode<synchronous>, transform_indices = @transform_1, window_bounds = array<i64: 128, 128>}, {pipeline_mode = #tpu.pipeline_mode<synchronous>, transform_indices = @transform_2, window_bounds = array<i64: 1, 128>}, {pipeline_mode = #tpu.pipeline_mode<synchronous>, transform_indices = @transform_3, window_bounds = array<i64: 128, 128>}, {pipeline_mode = #tpu.pipeline_mode<synchronous>, transform_indices = @transform_4, window_bounds = array<i64: 1, 128>}, {pipeline_mode = #tpu.pipeline_mode<synchronous>, transform_indices = @transform_5, window_bounds = array<i64: 128, 128>}, {pipeline_mode = #tpu.pipeline_mode<synchronous>, transform_indices = @transform_6, window_bounds = array<i64: 1, 128>}, {transform_indices = @transform_7, window_bounds = array<i64: 8, 128>}]} {
    %c0 = arith.constant 0 : index
    %c0_0 = arith.constant 0 : index
    %0 = vector.load %arg1[%c0, %c0_0] : memref<8x128xbf16, #tpu.memory_space<vmem>>, vector<8x128xbf16>
    %c0_1 = arith.constant 0 : index
    %c0_2 = arith.constant 0 : index
    %1 = vector.load %arg2[%c0_1, %c0_2] : memref<128x128xbf16, #tpu.memory_space<vmem>>, vector<128x128xbf16>
    %cst = arith.constant dense<0.000000e+00> : vector<8x128xf32>
    %2 = tpu.matmul %0, %1, %cst {dimension_numbers = #tpu.dot_dimension_numbers<[1], [0], [0], [1], [0, 0, 1, 1], [], []>} : vector<8x128xbf16>, vector<128x128xbf16>, vector<8x128xf32> -> vector<8x128xf32>
    %c0_3 = arith.constant 0 : index
    %c0_4 = arith.constant 0 : index
    %3 = vector.load %arg3[%c0_3, %c0_4] : memref<1x128xf32, #tpu.memory_space<vmem>>, vector<1x128xf32>
    %4 = vector.broadcast %3 : vector<1x128xf32> to vector<8x128xf32>
    %5 = arith.addf %2, %4 : vector<8x128xf32>
    %cst_5 = arith.constant 0.000000e+00 : f32
    %6 = vector.broadcast %cst_5 : f32 to vector<8x128xf32>
    %7 = arith.maximumf %5, %6 : vector<8x128xf32>
    %8 = arith.truncf %7 : vector<8x128xf32> to vector<8x128xbf16>
    %c0_6 = arith.constant 0 : index
    %c0_7 = arith.constant 0 : index
    %9 = vector.load %arg4[%c0_6, %c0_7] : memref<128x128xbf16, #tpu.memory_space<vmem>>, vector<128x128xbf16>
    %cst_8 = arith.constant dense<0.000000e+00> : vector<8x128xf32>
    %10 = tpu.matmul %8, %9, %cst_8 {dimension_numbers = #tpu.dot_dimension_numbers<[1], [0], [0], [1], [0, 0, 1, 1], [], []>} : vector<8x128xbf16>, vector<128x128xbf16>, vector<8x128xf32> -> vector<8x128xf32>
    %c0_9 = arith.constant 0 : index
    %c0_10 = arith.constant 0 : index
    %11 = vector.load %arg5[%c0_9, %c0_10] : memref<1x128xf32, #tpu.memory_space<vmem>>, vector<1x128xf32>
    %12 = vector.broadcast %11 : vector<1x128xf32> to vector<8x128xf32>
    %13 = arith.addf %10, %12 : vector<8x128xf32>
    %cst_11 = arith.constant 0.000000e+00 : f32
    %14 = vector.broadcast %cst_11 : f32 to vector<8x128xf32>
    %15 = arith.maximumf %13, %14 : vector<8x128xf32>
    %16 = arith.truncf %15 : vector<8x128xf32> to vector<8x128xbf16>
    %c0_12 = arith.constant 0 : index
    %c0_13 = arith.constant 0 : index
    %17 = vector.load %arg6[%c0_12, %c0_13] : memref<128x128xbf16, #tpu.memory_space<vmem>>, vector<128x128xbf16>
    %cst_14 = arith.constant dense<0.000000e+00> : vector<8x128xf32>
    %18 = tpu.matmul %16, %17, %cst_14 {dimension_numbers = #tpu.dot_dimension_numbers<[1], [0], [0], [1], [0, 0, 1, 1], [], []>} : vector<8x128xbf16>, vector<128x128xbf16>, vector<8x128xf32> -> vector<8x128xf32>
    %c0_15 = arith.constant 0 : index
    %c0_16 = arith.constant 0 : index
    %19 = vector.load %arg7[%c0_15, %c0_16] : memref<1x128xf32, #tpu.memory_space<vmem>>, vector<1x128xf32>
    %20 = vector.broadcast %19 : vector<1x128xf32> to vector<8x128xf32>
    %21 = arith.addf %18, %20 : vector<8x128xf32>
    %c0_17 = arith.constant 0 : index
    %c0_18 = arith.constant 0 : index
    %22 = vector.load %arg8[%c0_17, %c0_18] : memref<8x128xf32, #tpu.memory_space<vmem>>, vector<8x128xf32>
    tpu.vector_store %arg8[%c0_17, %c0_18], %21 {strides = array<i32>} : memref<8x128xf32, #tpu.memory_space<vmem>>, vector<8x128xf32>,
    return
  }
  func.func @transform_0(%arg0: i32) -> (i32, i32) {
    %c0_i32 = arith.constant 0 : i32
    %c0_i32_0 = arith.constant 0 : i32
    return %arg0, %c0_i32 : i32, i32
  }
  func.func @transform_1(%arg0: i32) -> (i32, i32) {
    %c0_i32 = arith.constant 0 : i32
    %c0_i32_0 = arith.constant 0 : i32
    %c0_i32_1 = arith.constant 0 : i32
    return %c0_i32, %c0_i32_0 : i32, i32
  }
  func.func @transform_2(%arg0: i32) -> (i32, i32) {
    %c0_i32 = arith.constant 0 : i32
    %c0_i32_0 = arith.constant 0 : i32
    %c0_i32_1 = arith.constant 0 : i32
    return %c0_i32, %c0_i32_0 : i32, i32
  }
  func.func @transform_3(%arg0: i32) -> (i32, i32) {
    %c0_i32 = arith.constant 0 : i32
    %c0_i32_0 = arith.constant 0 : i32
    %c0_i32_1 = arith.constant 0 : i32
    return %c0_i32, %c0_i32_0 : i32, i32
  }
  func.func @transform_4(%arg0: i32) -> (i32, i32) {
    %c0_i32 = arith.constant 0 : i32
    %c0_i32_0 = arith.constant 0 : i32
    %c0_i32_1 = arith.constant 0 : i32
    return %c0_i32, %c0_i32_0 : i32, i32
  }
  func.func @transform_5(%arg0: i32) -> (i32, i32) {
    %c0_i32 = arith.constant 0 : i32
    %c0_i32_0 = arith.constant 0 : i32
    %c0_i32_1 = arith.constant 0 : i32
    return %c0_i32, %c0_i32_0 : i32, i32
  }
  func.func @transform_6(%arg0: i32) -> (i32, i32) {
    %c0_i32 = arith.constant 0 : i32
    %c0_i32_0 = arith.constant 0 : i32
    %c0_i32_1 = arith.constant 0 : i32
    return %c0_i32, %c0_i32_0 : i32, i32
  }
  func.func @transform_7(%arg0: i32) -> (i32, i32) {
    %c0_i32 = arith.constant 0 : i32
    %c0_i32_0 = arith.constant 0 : i32
    return %arg0, %c0_i32 : i32, i32
  }
}

</mosaic_0001>

<bundles_post_ra>
// kernel: dqn_forward.1
= control target key start
LH: loop header
LB: loop body
LE: loop exit
PB: predicated region body
PF: predicated region fallthrough
CT: control target
= control target key end

     0   :  { %s874_s24 = smov 0   ;;  %s1006_s0 = inlined_call_operand.vmem [shape: bf16[24,128], index: 0, kind: input, shape index: {}]   ;;  %s1007_s1 = inlined_call_operand.vmem [shape: bf16[128,128], index: 1, kind: input, shape index: {}]   ;;  %s1008_s2 = inlined_call_operand.vmem [shape: f32[1,128], index: 2, kind: input, shape index: {}]   ;;  %s1009_s3 = inlined_call_operand.vmem [shape: bf16[128,128], index: 3, kind: input, shape index: {}]   ;;  %s1010_s4 = inlined_call_operand.vmem [shape: f32[1,128], index: 4, kind: input, shape index: {}]   ;;  %s1011_s5 = inlined_call_operand.vmem [shape: bf16[128,128], index: 5, kind: input, shape index: {}]   ;;  %s1012_s6 = inlined_call_operand.vmem [shape: f32[1,128], index: 6, kind: input, shape index: {}]   ;;  %s1013_s7 = inlined_call_operand.vmem [shape: f32[24,128], index: 7, kind: output, shape index: {}]  }
   0x1 LB: > { %s667_s25 = sadd.s32 4294967295, %s830_s24   ;;  %p671_p0 = scmp.ge.s32.totalorder %s830_s24, 1  ;;  %s830_s24 = sphi %s874_s24, %s17_s24  }
   0x2   : > { %p236_p1 = scmp.lt.s32.totalorder %s830_s24, 4 }
   0x4   : > { %p237_p2 = pnand %p671_p0, %p236_p1 }
   0x5   : > { %v800_v0 = vld [vmem:[%s1007_s1] sm:$0xff] (!%p237_p2)   ;;  %v832_v1 = vmov (!%p237_p2), 0.0   ;;  %v801_v2 = vld [vmem:[%s1007_s1 + $0x8] sm:$0xff] (!%p237_p2)   ;;  %vm833_vm0 = vmmov (!%p237_p2), 0   ;;  %v802_v3 = vld [vmem:[%s1007_s1 + $0x10] sm:$0xff] (!%p237_p2)   ;;  %p266_p3 = scmp.lt.s32.totalorder (!%p237_p2), %s667_s25, 2 }
   0x6   : > { %240 = sbr.rel (%p237_p2) target bundleno = 689 (0x2b1), region = 48  ;;  %730 = vmatprep.subr.bf16.mxu0 (!%p237_p2), %v832_v1  ;;  %750 = vmatprep.subr.bf16.mxu1 (!%p237_p2), %v832_v1  ;;  %v808_v4 = vld [vmem:[%s1009_s3] sm:$0xff] (!%p237_p2)   ;;  %v803_v5 = vld [vmem:[%s1007_s1 + $0x18] sm:$0xff] (!%p237_p2)   ;;  %v809_v6 = vld [vmem:[%s1009_s3 + $0x8] sm:$0xff] (!%p237_p2)  }
   0x7   : > { %731 = vmatpush3.bf16.msra.mxu0 (!%p237_p2), %v800_v0  ;;  %746 = vmatprep.mubr.msk.bf16.mxu0 (!%p237_p2), %vm833_vm0, %v832_v1  ;;  %v804_v7 = vld [vmem:[%s1007_s1 + $0x20] sm:$0xff] (!%p237_p2)   ;;  %v810_v8 = vld [vmem:[%s1009_s3 + $0x10] sm:$0xff] (!%p237_p2)   ;;  %v805_v9 = vld [vmem:[%s1007_s1 + $0x28] sm:$0xff] (!%p237_p2)  }
   0x8   : > { %732 = vmatprep.subr.bf16.mxu0 (!%p237_p2), %v832_v1  ;;  %766 = vmatprep.mubr.msk.bf16.mxu1 (!%p237_p2), %vm833_vm0, %v832_v1  ;;  %v811_v10 = vld [vmem:[%s1009_s3 + $0x18] sm:$0xff] (!%p237_p2)   ;;  %v806_v11 = vld [vmem:[%s1007_s1 + $0x30] sm:$0xff] (!%p237_p2)   ;;  %v812_v12 = vld [vmem:[%s1009_s3 + $0x20] sm:$0xff] (!%p237_p2)  }
   0x9   : > { %751 = vmatpush3.bf16.msra.mxu1 (!%p237_p2), %v808_v4  ;;  %v807_v13 = vld [vmem:[%s1007_s1 + $0x38] sm:$0xff] (!%p237_p2)   ;;  %v813_v14 = vld [vmem:[%s1009_s3 + $0x28] sm:$0xff] (!%p237_p2)   ;;  %v814_v16 = vld [vmem:[%s1009_s3 + $0x30] sm:$0xff] (!%p237_p2)  }
   0xa   : > { %752 = vmatprep.subr.bf16.mxu1 (!%p237_p2), %v832_v1  ;;  %v815_v17 = vld [vmem:[%s1009_s3 + $0x38] sm:$0xff] (!%p237_p2)   ;;  %v816_v18 = vld [vmem:[%s1011_s5] sm:$0xff] (!%p237_p2)   ;;  %v817_v19 = vld [vmem:[%s1011_s5 + $0x8] sm:$0xff] (!%p237_p2)  }
   0xb   : > { %733 = vmatpush3.bf16.msra.mxu0 (!%p237_p2), %v801_v2  ;;  %v818_v20 = vld [vmem:[%s1011_s5 + $0x10] sm:$0xff] (!%p237_p2)   ;;  %v819_v21 = vld [vmem:[%s1011_s5 + $0x18] sm:$0xff] (!%p237_p2)   ;;  %v820_v22 = vld [vmem:[%s1011_s5 + $0x20] sm:$0xff] (!%p237_p2)  }
   0xc   : > { %734 = vmatprep.subr.bf16.mxu0 (!%p237_p2), %v832_v1  ;;  %v821_v23 = vld [vmem:[%s1011_s5 + $0x28] sm:$0xff] (!%p237_p2)   ;;  %v674_v24 = vld [vmem:[%s1008_s2] ss:$0 sm:$0xff] (!%p237_p2)  ;;  %v822_v32 = vld [vmem:[%s1011_s5 + $0x30] sm:$0xff] (!%p237_p2)  }
   0xd   : > { %s1015_s25 = smov (!%p266_p3, %s667_s25), 2  ;;  %753 = vmatpush3.bf16.msra.mxu1 %v809_v6  ;;  %v823_v33 = vld [vmem:[%s1011_s5 + $0x38] sm:$0xff]   ;;  %v683_v34 = vld [vmem:[%s1010_s4] ss:$0 sm:$0xff] }
   0xe   : > { %754 = vmatprep.subr.bf16.mxu1 %v832_v1  ;;  %s672_s29 = sshll.u32 %s1015_s25, 2  ;;  %s673_s17 = sshll.u32 %s1015_s25, 3  ;;  %v692_v42 = vld [vmem:[%s1012_s6] ss:$0 sm:$0xff] }
   0xf   : > { %735 = vmatpush3.bf16.msra.mxu0 %v802_v3  ;;  %s269_s11 = scalar_lea.vmem %s1006_s0, %s672_s29  ;;  %s273_s22 = scalar_lea.vmem %s1013_s7, %s673_s17 }
  0x10   : > { %736 = vmatprep.subr.bf16.mxu0 %v832_v1  ;;  %v275_v15 = vld [vmem:[%s269_s11] sm:$0xf] }
  0x11   : > { %755 = vmatpush3.bf16.msra.mxu1 %v810_v8 }
  0x12   : > { %756 = vmatprep.subr.bf16.mxu1 %v832_v1 }
  0x13   : > { %737 = vmatpush3.bf16.msra.mxu0 %v803_v5 }
  0x14   : > { %738 = vmatprep.subr.bf16.mxu0 %v832_v1 }
  0x15   : > { %757 = vmatpush3.bf16.msra.mxu1 %v811_v10 }
  0x16   : > { %758 = vmatprep.subr.bf16.mxu1 %v832_v1 }
  0x17   : > { %739 = vmatpush3.bf16.msra.mxu0 %v804_v7 }
  0x18   : > { %740 = vmatprep.subr.bf16.mxu0 %v832_v1 }
  0x19   : > { %759 = vmatpush3.bf16.msra.mxu1 %v812_v12 }
  0x1a   : > { %760 = vmatprep.subr.bf16.mxu1 %v832_v1 }
  0x1b   : > { %741 = vmatpush3.bf16.msra.mxu0 %v805_v9 }
  0x1c   : > { %742 = vmatprep.subr.bf16.mxu0 %v832_v1 }
  0x1d   : > { %761 = vmatpush3.bf16.msra.mxu1 %v813_v14 }
  0x1e   : > { %762 = vmatprep.subr.bf16.mxu1 %v832_v1 }
  0x1f   : > { %743 = vmatpush3.bf16.msra.mxu0 %v806_v11 }
  0x20   : > { %744 = vmatprep.subr.bf16.mxu0 %v832_v1 }
  0x21   : > { %763 = vmatpush3.bf16.msra.mxu1 %v814_v16 }
  0x22   : > { %764 = vmatprep.subr.bf16.mxu1 %v832_v1 }
  0x23   : > { %745 = vmatpush3.bf16.msra.mxu0 %v807_v13 }
  0x24   : > { %770 = vmatprep.subr.bf16.mxu0 %v832_v1 }
  0x25   : > { %765 = vmatpush3.bf16.msra.mxu1 %v815_v17 }
  0x26   : > { %747 = vmatmul.mubr.bf16.vlgmr.msra.gmra.mrb[0].mxu0 %v275_v15 }
  0x27   : > { %786 = vmatprep.mubr.msk.bf16.mxu0 %vm833_vm0, %v832_v1  ;;  %771 = vmatpush3.bf16.msra.mxu0 %v816_v18 }
  0x28   : > { %772 = vmatprep.subr.bf16.mxu0 %v832_v1 }
  0x2b   : > { %773 = vmatpush3.bf16.msra.mxu0 %v817_v19 }
  0x2c   : > { %774 = vmatprep.subr.bf16.mxu0 %v832_v1 }
  0x2f   : > { %775 = vmatpush3.bf16.msra.mxu0 %v818_v20 }
  0x30   : > { %776 = vmatprep.subr.bf16.mxu0 %v832_v1 }
  0x33   : > { %777 = vmatpush3.bf16.msra.mxu0 %v819_v21 }
  0x34   : > { %778 = vmatprep.subr.bf16.mxu0 %v832_v1 }
  0x37   : > { %779 = vmatpush3.bf16.msra.mxu0 %v820_v22 }
  0x38   : > { %780 = vmatprep.subr.bf16.mxu0 %v832_v1 }
  0x3b   : > { %781 = vmatpush3.bf16.msra.mxu0 %v821_v23 }
  0x3c   : > { %782 = vmatprep.subr.bf16.mxu0 %v832_v1 }
  0x3f   : > { %783 = vmatpush3.bf16.msra.mxu0 %v822_v32 }
  0x40   : > { %784 = vmatprep.subr.bf16.mxu0 %v832_v1 }
  0x43   : > { %785 = vmatpush3.bf16.msra.mxu0 %v823_v33 }
  0xf9   : > { %v381_v25 = vpop.f32.mrb[0].mxu0 }
  0xfa   : > { %v382_v26 = vadd.f32 %v674_v24, %v381_v25  ;;  %v748_v27 = vpop.f32.mrb[1].mxu0 }
  0xfb   : > { %v384_v28 = vpop.f32.mrb[2].mxu0 }
  0xfc   : > { %v387_v29 = vmax.f32 %v382_v26, 0.0  ;;  %v749_v30 = vpop.f32.mrb[3].mxu0 }
  0xfe   : > { %v388_v31 = vpack.c.bf16 %v387_v29, %v387_v29 }
 0x100   : > { %767 = vmatmul.mubr.bf16.vlgmr.msra.gmra.mrb[0].mxu1 %v388_v31 }
 0x1d3   : > { %v494_v35 = vpop.f32.mrb[0].mxu1 }
 0x1d4   : > { %v495_v36 = vadd.f32 %v683_v34, %v494_v35  ;;  %v768_v37 = vpop.f32.mrb[1].mxu1 }
 0x1d5   : > { %v497_v38 = vpop.f32.mrb[2].mxu1 }
 0x1d6   : > { %v500_v39 = vmax.f32 %v495_v36, 0.0  ;;  %v769_v40 = vpop.f32.mrb[3].mxu1 }
 0x1d8   : > { %v501_v41 = vpack.c.bf16 %v500_v39, %v500_v39 }
 0x1da   : > { %787 = vmatmul.mubr.bf16.vlgmr.msra.gmra.mrb[4].mxu0 %v501_v41 }
 0x2ad   : > { %v607_v43 = vpop.f32.mrb[4].mxu0 }
 0x2ae   : > { %v608_v44 = vadd.f32 %v692_v42, %v607_v43  ;;  %v788_v45 = vpop.f32.mrb[5].mxu0 }
 0x2af   : > { %v610_v46 = vpop.f32.mrb[6].mxu0 }
 0x2b0   : > { %613 = vst [vmem:[%s273_s22] sm:$0xff] %v608_v44  ;;  %v789_v47 = vpop.f32.mrb[7].mxu0 }
 0x2b1 PF: > { %s17_s24 = sadd.s32 1, %s830_s24  }
 0x2b2   : > { %p14_p4 = scmp.ge.s32.totalorder %s17_s24, 5  }
 0x2b4   :  { %16 = sbr.rel (!%p14_p4) target bundleno = 1 (0x1), region = 78 }

</bundles_post_ra>
